<compile_context>
chip_gen: v7x
topology: tpu7x:2x2x1
jax: 0.10.0
libtpu: 0.0.40
codegen_flags: <defaults>
</compile_context>

<pallas_src>
import jax
import jax.numpy as jnp
from jax.experimental import pallas as pl
from jax.experimental.pallas import tpu as pltpu

BN_EPS = 1e-5
ATT_CH = 128  # hard-coded out_channels of fc1 in the module

# Default spatial tile (lanes). 2048 keeps double-buffered x + the (128, T)
# intermediate comfortably under the v7x 32 MiB scoped-VMEM default even for
# C up to ~512; on v5e/v6e (128 MiB VMEM) a larger max_tile_hw can be passed.
DEFAULT_MAX_TILE_HW = 2048


def _pick_tile_hw(hw, max_tile):
    """Largest tile <= max_tile that is a multiple of 128 and divides hw."""
    if hw <= max_tile:
        return hw
    t = (max_tile // 128) * 128
    while t >= 128:
        if hw % t == 0:
            return t
        t -= 128
    return hw  # fallback: no clean tiling -> single block


def _make_asp_kernel(matmul_dtype):
    def _asp_kernel(x_ref, w1_ref, b1_ref, w2_ref, b2_ref, out_ref):
        # x_ref: (C, T)  w1_ref: (128, C)  b1_ref: (128, 1)  [BN pre-folded]
        # w2_ref: (C, 128)  b2_ref: (C, 1)  out_ref: (2, T)
        x = x_ref[...].astype(jnp.float32)                              # (C, T)
        xm = x.astype(matmul_dtype)

        # fc1 (1x1 conv, BN folded): (128, C) @ (C, T) -> (128, T), f32 acc
        h = jnp.dot(w1_ref[...].astype(matmul_dtype), xm,
                    preferred_element_type=jnp.float32) + b1_ref[...]
        # relu
        h = jnp.maximum(h, 0.0)

        # fc2 (1x1 conv): (C, 128) @ (128, T) -> (C, T), f32 acc
        logits = jnp.dot(w2_ref[...].astype(matmul_dtype),
                         h.astype(matmul_dtype),
                         preferred_element_type=jnp.float32) + b2_ref[...]

        # softmax over channel dim (torch dim=1 == sublane axis here)
        m = jnp.max(logits, axis=0, keepdims=True)
        e = jnp.exp(logits - m)
        denom = jnp.sum(e, axis=0, keepdims=True)
        w = e * pl.reciprocal(denom, approx=False)                      # (C, T)

        # attentive statistics over channel dim (reuse w*x)
        c = x.shape[0]
        wx = w * x
        mu = jnp.sum(wx, axis=0, keepdims=True) * (1.0 / c)             # (1, T)
        # sum_c (w*x^2 - mu^2) = sum_c(w*x^2) - C * mu^2
        s = jnp.sum(wx * x, axis=0, keepdims=True) - c * mu * mu
        sigma = jnp.sqrt(jnp.maximum(s, 1e-8))                          # (1, T)

        # single lane-dense 2-row store
        out_ref[...] = jnp.concatenate([mu, sigma], axis=0)

    return _asp_kernel


def attentive_statistics_pooling(x, params, *, max_tile_hw=DEFAULT_MAX_TILE_HW,
                                 matmul_dtype=None):
    """x: (B, C, H, W) float32 (NCHW). Returns (B, 1, H, 2*W)."""
    w1, b1, gamma, beta, rmean, rvar, w2, b2 = params
    B, C, H, W = x.shape
    HW = H * W

    # bf16 on the MXU only when C is large enough for the matmuls to matter;
    # tiny-C matmuls (e.g. C=4) stay f32 (exact, MXU gain is nil there anyway).
    if matmul_dtype is None:
        matmul_dtype = jnp.bfloat16 if C >= 32 else jnp.float32

    # Fold eval-mode BatchNorm into fc1:
    #   h = gamma * (w1 x + b1 - mean) * rsqrt(var+eps) + beta
    #     = (scale * w1) x + ((b1 - mean) * scale + beta),  scale = gamma*rsqrt(var+eps)
    scale = gamma * jax.lax.rsqrt(rvar + BN_EPS)
    w1_eff = (scale[:, None] * w1).astype(jnp.float32)                  # (128, C)
    b1_eff = ((b1 - rmean) * scale + beta).reshape(ATT_CH, 1).astype(jnp.float32)
    b2c = b2.reshape(C, 1).astype(jnp.float32)

    tile_hw = _pick_tile_hw(HW, max_tile_hw)
    n_tiles = HW // tile_hw
    x_flat = x.reshape(B, C, HW)

    const = lambda b, t: (0, 0)
    out = pl.pallas_call(
        _make_asp_kernel(matmul_dtype),
        out_shape=jax.ShapeDtypeStruct((B, 2, HW), jnp.float32),
        grid=(B, n_tiles),
        in_specs=[
            pl.BlockSpec((None, C, tile_hw), lambda b, t: (b, 0, t)),   # x
            pl.BlockSpec((ATT_CH, C), const),                           # w1 (BN folded)
            pl.BlockSpec((ATT_CH, 1), const),                           # b1 (BN folded)
            pl.BlockSpec((C, ATT_CH), const),                           # w2
            pl.BlockSpec((C, 1), const),                                # b2
        ],
        out_specs=pl.BlockSpec((None, 2, tile_hw), lambda b, t: (b, 0, t)),
        compiler_params=pltpu.CompilerParams(
            dimension_semantics=("parallel", "parallel"),
            vmem_limit_bytes=32 * 1024 * 1024),
    )(x_flat, w1_eff, b1_eff, w2, b2c)

    mu = out[:, 0, :].reshape(B, 1, H, W)
    sigma = out[:, 1, :].reshape(B, 1, H, W)
    return jnp.concatenate([mu, sigma], axis=-1)                        # (B, 1, H, 2W)


def reference(x, params):
    """Plain-JAX mirror of the PyTorch forward (NCHW, eval-mode BN)."""
    w1, b1, gamma, beta, rmean, rvar, w2, b2 = params
    h = jnp.einsum('oc,bchw->bohw', w1, x) + b1[None, :, None, None]
    h = (h - rmean[None, :, None, None]) * jax.lax.rsqrt(
        rvar[None, :, None, None] + BN_EPS) * gamma[None, :, None, None] \
        + beta[None, :, None, None]
    h = jax.nn.relu(h)
    logits = jnp.einsum('co,bohw->bchw', w2, h) + b2[None, :, None, None]
    w = jax.nn.softmax(logits, axis=1)
    mu = jnp.mean(w * x, axis=1, keepdims=True)
    s = jnp.sum(w * x ** 2 - mu ** 2, axis=1, keepdims=True)
    sigma = jnp.sqrt(jnp.clip(s, 1e-8))
    return jnp.concatenate([mu, sigma], axis=-1)


def init_params(key, in_channels):
    ks = jax.random.split(key, 8)
    w1 = 0.1 * jax.random.normal(ks[0], (ATT_CH, in_channels), jnp.float32)
    b1 = 0.1 * jax.random.normal(ks[1], (ATT_CH,), jnp.float32)
    gamma = 1.0 + 0.1 * jax.random.normal(ks[2], (ATT_CH,), jnp.float32)
    beta = 0.1 * jax.random.normal(ks[3], (ATT_CH,), jnp.float32)
    rmean = 0.1 * jax.random.normal(ks[4], (ATT_CH,), jnp.float32)
    rvar = jnp.abs(1.0 + 0.1 * jax.random.normal(ks[5], (ATT_CH,), jnp.float32))
    w2 = 0.1 * jax.random.normal(ks[6], (in_channels, ATT_CH), jnp.float32)
    b2 = 0.1 * jax.random.normal(ks[7], (in_channels,), jnp.float32)
    return (w1, b1, gamma, beta, rmean, rvar, w2, b2)


if __name__ == "__main__":
    key = jax.random.PRNGKey(0)
    kx, kp, kx2, kp2 = jax.random.split(key, 4)

    # Small-shape check (C=4 -> f32 matmul path), matches the module spec shapes.
    B, C, H, W = 2, 4, 16, 16
    x = jax.random.normal(kx, (B, C, H, W), jnp.float32)
    params = init_params(kp, C)
    out = jax.block_until_ready(attentive_statistics_pooling(x, params))
    ref = jax.block_until_ready(reference(x, params))
    assert out.shape == (B, 1, H, 2 * W), out.shape
    assert jnp.allclose(out, ref, rtol=1e-3, atol=1e-3), \
        float(jnp.max(jnp.abs(out - ref)))

    # Production-ish channel count exercises the bf16 MXU path (C >= 32).
    C2 = 128
    x2 = jax.random.normal(kx2, (B, C2, H, W), jnp.float32)
    params2 = init_params(kp2, C2)
    out2 = jax.block_until_ready(attentive_statistics_pooling(x2, params2))
    ref2 = jax.block_until_ready(reference(x2, params2))
    assert out2.shape == (B, 1, H, 2 * W), out2.shape
    assert jnp.allclose(out2, ref2, rtol=2e-2, atol=2e-2), \
        float(jnp.max(jnp.abs(out2 - ref2)))

    print("KERNEL_OK")
</pallas_src>

<mosaic_0001>
module attributes {stable_mosaic.version = 11 : i64} {
  func.func @_asp_kernel(%arg0: i32, %arg1: i32, %arg2: memref<1x4x256xf32, #tpu.memory_space<vmem>>, %arg3: memref<128x4xf32, #tpu.memory_space<vmem>>, %arg4: memref<128x1xf32, #tpu.memory_space<vmem>>, %arg5: memref<4x128xf32, #tpu.memory_space<vmem>>, %arg6: memref<4x1xf32, #tpu.memory_space<vmem>>, %arg7: memref<1x2x256xf32, #tpu.memory_space<vmem>>) attributes {dimension_semantics = [#tpu.dimension_semantics<parallel>, #tpu.dimension_semantics<parallel>], iteration_bounds = array<i64: 2, 1>, scalar_prefetch = 0 : i64, scratch_operands = 0 : i64, tpu.core_type = #tpu.core_type<tc>, window_params = [{transform_indices = @transform_0, window_bounds = array<i64: 1, 4, 256>}, {pipeline_mode = #tpu.pipeline_mode<synchronous>, transform_indices = @transform_1, window_bounds = array<i64: 128, 4>}, {pipeline_mode = #tpu.pipeline_mode<synchronous>, transform_indices = @transform_2, window_bounds = array<i64: 128, 1>}, {pipeline_mode = #tpu.pipeline_mode<synchronous>, transform_indices = @transform_3, window_bounds = array<i64: 4, 128>}, {pipeline_mode = #tpu.pipeline_mode<synchronous>, transform_indices = @transform_4, window_bounds = array<i64: 4, 1>}, {transform_indices = @transform_5, window_bounds = array<i64: 1, 2, 256>}]} {
    %c0 = arith.constant 0 : index
    %c0_0 = arith.constant 0 : index
    %c0_1 = arith.constant 0 : index
    %0 = vector.load %arg2[%c0, %c0_0, %c0_1] : memref<1x4x256xf32, #tpu.memory_space<vmem>>, vector<1x4x256xf32>
    %1 = vector.shape_cast %0 : vector<1x4x256xf32> to vector<4x256xf32>
    %c0_2 = arith.constant 0 : index
    %c0_3 = arith.constant 0 : index
    %2 = vector.load %arg3[%c0_2, %c0_3] : memref<128x4xf32, #tpu.memory_space<vmem>>, vector<128x4xf32>
    %cst = arith.constant dense<0.000000e+00> : vector<128x256xf32>
    %3 = tpu.matmul %2, %1, %cst {dimension_numbers = #tpu.dot_dimension_numbers<[1], [0], [0], [1], [0, 0, 1, 1], [], []>} : vector<128x4xf32>, vector<4x256xf32>, vector<128x256xf32> -> vector<128x256xf32>
    %c0_4 = arith.constant 0 : index
    %c0_5 = arith.constant 0 : index
    %4 = vector.load %arg4[%c0_4, %c0_5] : memref<128x1xf32, #tpu.memory_space<vmem>>, vector<128x1xf32>
    %5 = vector.broadcast %4 : vector<128x1xf32> to vector<128x256xf32>
    %6 = arith.addf %3, %5 : vector<128x256xf32>
    %cst_6 = arith.constant 0.000000e+00 : f32
    %7 = vector.broadcast %cst_6 : f32 to vector<128x256xf32>
    %8 = arith.maximumf %6, %7 : vector<128x256xf32>
    %c0_7 = arith.constant 0 : index
    %c0_8 = arith.constant 0 : index
    %9 = vector.load %arg5[%c0_7, %c0_8] : memref<4x128xf32, #tpu.memory_space<vmem>>, vector<4x128xf32>
    %cst_9 = arith.constant dense<0.000000e+00> : vector<4x256xf32>
    %10 = tpu.matmul %9, %8, %cst_9 {dimension_numbers = #tpu.dot_dimension_numbers<[1], [0], [0], [1], [0, 0, 1, 1], [], []>} : vector<4x128xf32>, vector<128x256xf32>, vector<4x256xf32> -> vector<4x256xf32>
    %c0_10 = arith.constant 0 : index
    %c0_11 = arith.constant 0 : index
    %11 = vector.load %arg6[%c0_10, %c0_11] : memref<4x1xf32, #tpu.memory_space<vmem>>, vector<4x1xf32>
    %12 = vector.broadcast %11 : vector<4x1xf32> to vector<4x256xf32>
    %13 = arith.addf %10, %12 : vector<4x256xf32>
    %cst_12 = arith.constant dense<0xFF800000> : vector<256xf32>
    %14 = vector.multi_reduction <maximumf>, %13, %cst_12 [0] : vector<4x256xf32> to vector<256xf32>
    %15 = vector.shape_cast %14 : vector<256xf32> to vector<1x256xf32>
    %16 = vector.broadcast %15 : vector<1x256xf32> to vector<4x256xf32>
    %17 = arith.subf %13, %16 : vector<4x256xf32>
    %18 = math.exp %17 : vector<4x256xf32>
    %cst_13 = arith.constant dense<0.000000e+00> : vector<256xf32>
    %19 = vector.multi_reduction <add>, %18, %cst_13 [0] : vector<4x256xf32> to vector<256xf32>
    %20 = vector.shape_cast %19 : vector<256xf32> to vector<1x256xf32>
    %21 = tpu.reciprocal %20 : vector<1x256xf32> -> vector<1x256xf32>
    %22 = vector.broadcast %21 : vector<1x256xf32> to vector<4x256xf32>
    %23 = arith.mulf %18, %22 : vector<4x256xf32>
    %24 = arith.mulf %23, %1 : vector<4x256xf32>
    %cst_14 = arith.constant dense<0.000000e+00> : vector<256xf32>
    %25 = vector.multi_reduction <add>, %24, %cst_14 [0] : vector<4x256xf32> to vector<256xf32>
    %26 = vector.shape_cast %25 : vector<256xf32> to vector<1x256xf32>
    %cst_15 = arith.constant 2.500000e-01 : f32
    %27 = vector.broadcast %cst_15 : f32 to vector<1x256xf32>
    %28 = arith.mulf %26, %27 : vector<1x256xf32>
    %29 = arith.mulf %24, %1 : vector<4x256xf32>
    %cst_16 = arith.constant dense<0.000000e+00> : vector<256xf32>
    %30 = vector.multi_reduction <add>, %29, %cst_16 [0] : vector<4x256xf32> to vector<256xf32>
    %31 = vector.shape_cast %30 : vector<256xf32> to vector<1x256xf32>
    %cst_17 = arith.constant 4.000000e+00 : f32
    %32 = vector.broadcast %cst_17 : f32 to vector<1x256xf32>
    %33 = arith.mulf %32, %28 : vector<1x256xf32>
    %34 = arith.mulf %33, %28 : vector<1x256xf32>
    %35 = arith.subf %31, %34 : vector<1x256xf32>
    %cst_18 = arith.constant 9.99999993E-9 : f32
    %36 = vector.broadcast %cst_18 : f32 to vector<1x256xf32>
    %37 = arith.maximumf %35, %36 : vector<1x256xf32>
    %38 = math.sqrt %37 : vector<1x256xf32>
    %39 = tpu.concatenate %28, %38 in 0 : vector<1x256xf32>, vector<1x256xf32> -> vector<2x256xf32>
    %c0_19 = arith.constant 0 : index
    %c0_20 = arith.constant 0 : index
    %c0_21 = arith.constant 0 : index
    %40 = vector.load %arg7[%c0_19, %c0_20, %c0_21] : memref<1x2x256xf32, #tpu.memory_space<vmem>>, vector<1x2x256xf32>
    %41 = vector.shape_cast %40 : vector<1x2x256xf32> to vector<2x256xf32>
    %42 = vector.shape_cast %39 : vector<2x256xf32> to vector<1x2x256xf32>
    tpu.vector_store %arg7[%c0_19, %c0_20, %c0_21], %42 {strides = array<i32>} : memref<1x2x256xf32, #tpu.memory_space<vmem>>, vector<1x2x256xf32>,
    return
  }
  func.func @transform_0(%arg0: i32, %arg1: i32) -> (i32, i32, i32) {
    %c0_i32 = arith.constant 0 : i32
    %c0_i32_0 = arith.constant 0 : i32
    return %arg0, %c0_i32, %arg1 : i32, i32, i32
  }
  func.func @transform_1(%arg0: i32, %arg1: i32) -> (i32, i32) {
    %c0_i32 = arith.constant 0 : i32
    %c0_i32_0 = arith.constant 0 : i32
    %c0_i32_1 = arith.constant 0 : i32
    return %c0_i32, %c0_i32_0 : i32, i32
  }
  func.func @transform_2(%arg0: i32, %arg1: i32) -> (i32, i32) {
    %c0_i32 = arith.constant 0 : i32
    %c0_i32_0 = arith.constant 0 : i32
    %c0_i32_1 = arith.constant 0 : i32
    return %c0_i32, %c0_i32_0 : i32, i32
  }
  func.func @transform_3(%arg0: i32, %arg1: i32) -> (i32, i32) {
    %c0_i32 = arith.constant 0 : i32
    %c0_i32_0 = arith.constant 0 : i32
    %c0_i32_1 = arith.constant 0 : i32
    return %c0_i32, %c0_i32_0 : i32, i32
  }
  func.func @transform_4(%arg0: i32, %arg1: i32) -> (i32, i32) {
    %c0_i32 = arith.constant 0 : i32
    %c0_i32_0 = arith.constant 0 : i32
    %c0_i32_1 = arith.constant 0 : i32
    return %c0_i32, %c0_i32_0 : i32, i32
  }
  func.func @transform_5(%arg0: i32, %arg1: i32) -> (i32, i32, i32) {
    %c0_i32 = arith.constant 0 : i32
    %c0_i32_0 = arith.constant 0 : i32
    return %arg0, %c0_i32, %arg1 : i32, i32, i32
  }
}

</mosaic_0001>

<bundles_post_ra>
// kernel: tpu_custom_call.1
= control target key start
LH: loop header
LB: loop body
LE: loop exit
PB: predicated region body
PF: predicated region fallthrough
CT: control target
= control target key end

     0   :  { %10 = vsyncpa [#allocation3], 0  ;;  %s1417_s0 = inlined_call_operand.vmem [shape: f32[2,4,256], index: 0, kind: input, shape index: {}]   ;;  %s1418_s1 = inlined_call_operand.vmem [shape: f32[128,4], index: 1, kind: input, shape index: {}]   ;;  %s1419_s2 = inlined_call_operand.vmem [shape: f32[128,1], index: 2, kind: input, shape index: {}]   ;;  %s1420_s3 = inlined_call_operand.vmem [shape: f32[4,128], index: 3, kind: input, shape index: {}]   ;;  %s1421_s4 = inlined_call_operand.vmem [shape: f32[4,1], index: 4, kind: input, shape index: {}]   ;;  %s1422_s5 = inlined_call_operand.hbm [shape: f32[2,2,256], index: 5, kind: output, shape index: {}]  }
   0x1   :  { %12 = vsyncpa [#allocation3 + $0x1], 0  ;;  %s1148_s18 = smov 0   ;;  %s1150_s19 = smov 0  }
   0x2   :  { %s1152_s20 = smov 0   ;;  %s1154_s21 = smov 0  }
   0x3   :  { %s1156_s22 = smov 0   ;;  %s1158_s23 = smov 0  }
   0x4 LB: > { %s897_s24 = sadd.s32 4294967295, %s1113_s23   ;;  %s898_s25 = sadd.s32 4294967294, %s1113_s23   ;;  %s1113_s23 = sphi %s1158_s23, %s18_s23   ;;  %s1109_s22 = sphi %s1156_s22, %s1429_s22   ;;  %s1105_s21 = sphi %s1154_s21, %s1428_s21   ;;  %s1101_s20 = sphi %s1152_s20, %s1427_s20   ;;  %s1097_s19 = sphi %s1150_s19, %s1426_s19   ;;  %s1093_s18 = sphi %s1148_s18, %s1425_s18  }
   0x5   : > { %s30_s26 = sadd.s32 1, %s1109_s22  ;;  %s151_s27 = sadd.s32 1, %s1101_s20 }
   0x6   : > { %p32_p0 = scmp.ge.s32.totalorder %s30_s26, 2  ;;  %p161_p1 = scmp.ne.s32.totalorder %s1101_s20, %s1097_s19 }
   0x7   : > { %p162_p2 = scmp.eq.s32.totalorder %s897_s24, 1  ;;  %p167_p3 = scmp.ne.s32.totalorder %s1097_s19, %s1093_s18 }
   0x8   : > { %s1431_s26 = smov (%p32_p0, %s30_s26), 0  ;;  %p168_p5 = scmp.eq.s32.totalorder %s898_s25, 1 }
   0x9   : > { %p1188_p4 = por %p162_p2, %p161_p1  ;;  %s146_s29 = ssub.s32 %s1109_s22, %s1431_s26 }
   0xa   : > { %p901_p6 = scmp.ge.s32.totalorder %s1113_s23, 1  ;;  %p149_p7 = scmp.eq.s32.totalorder %s146_s29, 0 }
   0xb   : > { %p1195_p8 = por %p168_p5, %p167_p3  ;;  %p211_p9 = scmp.lt.s32.totalorder %s1113_s23, 3 }
   0xc   : > { %s1201_s6 = scalar_select %p149_p7, %s1101_s20, %s151_s27  }
   0xd   : > { %p212_p10 = pnand %p901_p6, %p211_p9 }
   0xe   : > { %p244_p11 = scmp.lt.s32.totalorder (!%p212_p10), %s1105_s21, 1  ;;  %v1115_v0 = vmov (!%p212_p10), 0.0   ;;  %v1116_v1 = vmov (!%p212_p10), 0   ;;  %v271_v2 = vld [vmem:[%s1419_s2] sm:$0xff] (!%p212_p10)  ;;  %vm418_vm0 = vcmask (!%p212_p10), 1043456   ;;  %v273_v4 = vld [vmem:[%s1419_s2 + $0x10] sm:$0xff] (!%p212_p10) }
   0xf   : > { %215 = sbr.rel (%p212_p10) target bundleno = 640 (0x280), region = 40  ;;  %487 = vmatprep.mubr.f32.mxu0 (!%p212_p10), %v1115_v0  ;;  %687 = vmatprep.mubr.f32.mxu1 (!%p212_p10), %v1115_v0  ;;  %v272_v6 = vld [vmem:[%s1419_s2 + $0x8] sm:$0xff] (!%p212_p10)  ;;  %v255_v7 = vld [vmem:[%s1418_s1] sm:$0xff] (!%p212_p10)  ;;  %vm369_vm1 = vcmask (!%p212_p10), 31744   ;;  %v274_v8 = vld [vmem:[%s1419_s2 + $0x18] sm:$0xff] (!%p212_p10)  ;;  %s240_s27 = sand.u32 (!%p212_p10), 1, %s1097_s19  }
  0x10   : > { %1020 = vset.pattern.permute.xlu0 (!%p212_p10), %v1116_v1  ;;  %1021 = vset.pattern.permute.xlu1 (!%p212_p10), %v1116_v1  ;;  %v275_v9 = vld [vmem:[%s1419_s2 + $0x20] sm:$0xff] (!%p212_p10)  ;;  %v256_v10 = vld [vmem:[%s1418_s1 + $0x8] sm:$0xff] (!%p212_p10)  ;;  %v277_v12 = vld [vmem:[%s1419_s2 + $0x30] sm:$0xff] (!%p212_p10)  ;;  %s902_s29 = sshll.u32 (!%p212_p10), %s240_s27, 2  ;;  %vm789_vm3 = vcmask (!%p212_p10), 1040384   ;;  %s805_s13 = scalar_lea.sflag (!%p212_p10), [#allocation3], %s240_s27 }
  0x11   : > { %289 = vperm.xlu0 (!%p212_p10), %1020, %v271_v2   ;;  %299 = vperm.xlu1 (!%p212_p10), %1021, %v273_v4   ;;  %v276_v11 = vld [vmem:[%s1419_s2 + $0x28] sm:$0xff] (!%p212_p10)  ;;  %v257_v13 = vld [vmem:[%s1418_s1 + $0x10] sm:$0xff] (!%p212_p10)  ;;  %v278_v14 = vld [vmem:[%s1419_s2 + $0x38] sm:$0xff] (!%p212_p10) }
  0x12   : > { %v279_v15 = vld [vmem:[%s1419_s2 + $0x40] sm:$0xff] (!%p212_p10)  ;;  %v258_v16 = vld [vmem:[%s1418_s1 + $0x18] sm:$0xff] (!%p212_p10)  ;;  %v280_v17 = vld [vmem:[%s1419_s2 + $0x48] sm:$0xff] (!%p212_p10) }
  0x13   : > { %v281_v18 = vld [vmem:[%s1419_s2 + $0x50] sm:$0xff] (!%p212_p10)  ;;  %v259_v19 = vld [vmem:[%s1418_s1 + $0x20] sm:$0xff] (!%p212_p10)  ;;  %v282_v20 = vld [vmem:[%s1419_s2 + $0x58] sm:$0xff] (!%p212_p10) }
  0x14   : > { %v283_v21 = vld [vmem:[%s1419_s2 + $0x60] sm:$0xff] (!%p212_p10)  ;;  %v260_v22 = vld [vmem:[%s1418_s1 + $0x28] sm:$0xff] (!%p212_p10)  ;;  %v285_v24 = vld [vmem:[%s1419_s2 + $0x70] sm:$0xff] (!%p212_p10) }
  0x15   : > { %294 = vperm.xlu0 (!%p212_p10), %1020, %v272_v6   ;;  %304 = vperm.xlu1 (!%p212_p10), %1021, %v274_v8   ;;  %v284_v23 = vld [vmem:[%s1419_s2 + $0x68] sm:$0xff] (!%p212_p10)  ;;  %v261_v25 = vld [vmem:[%s1418_s1 + $0x30] sm:$0xff] (!%p212_p10)  ;;  %v286_v26 = vld [vmem:[%s1419_s2 + $0x78] sm:$0xff] (!%p212_p10) }
  0x16   : > { %s245_s7 = scalar_select %p244_p11, %s1105_s21, 1  ;;  %v617_v27 = vld [vmem:[%s1421_s4] sm:$0xf]  ;;  %v262_v28 = vld [vmem:[%s1418_s1 + $0x38] sm:$0xff]  ;;  %v264_v30 = vld [vmem:[%s1418_s1 + $0x48] sm:$0xff] }
  0x17   : > { %v263_v29 = vld [vmem:[%s1418_s1 + $0x40] sm:$0xff]  ;;  %v265_v31 = vld [vmem:[%s1418_s1 + $0x50] sm:$0xff]  ;;  %v266_v32 = vld [vmem:[%s1418_s1 + $0x58] sm:$0xff] }
  0x18   : > { %s929_s8 = sshll.u32 %s245_s7, 3  ;;  %v267_v33 = vld [vmem:[%s1418_s1 + $0x60] sm:$0xff]  ;;  %v268_v34 = vld [vmem:[%s1418_s1 + $0x68] sm:$0xff]  ;;  %v269_v35 = vld [vmem:[%s1418_s1 + $0x70] sm:$0xff]  ;;  %s930_s7 = sshll.u32 %s1105_s21, 6 }
  0x19   : > { %s251_s11 = scalar_lea.vmem %s1417_s0, %s929_s8  ;;  %309 = vperm.xlu0 %1020, %v275_v9   ;;  %314 = vperm.xlu1 %1021, %v276_v11   ;;  %v270_v36 = vld [vmem:[%s1418_s1 + $0x78] sm:$0xff]  ;;  %s242_s8 = scalar_lea.vmem [#allocation2], %s902_s29 }
  0x1a   : > { %v1213_v3 = vld [vmem:[%s251_s11] sm:$0xff]  ;;  %s821_s9 = sshll.u32 %s242_s8, 4  ;;  %s1370_s12 = scalar_lea.hbm %s1422_s5, %s930_s7  ;;  %s1372_s9 = int_to_ptr.vmem [resolvable:$true] %s821_s9 }
  0x1b   : > { %v1220_v5 = vcombine.high %v1213_v3, %v1213_v3  ;;  %s1035_s14 = scalar_lea.vmem %s1372_s9, 64  ;;  %s1117_s21 = smov [#allocation2]  }
  0x1c   : > { %p1036_p12 = scmp.ne.s32.totalorder %s1372_s9, %s1035_s14  ;;  %s1039_s15 = sshll.u32 %s1117_s21, 4  ;;  %s1040_s15 = int_to_ptr.vmem [resolvable:$false] %s1039_s15 }
  0x1d   : > { %905 = vmatprep.subr.msk.mxu0 %vm418_vm0, %v1220_v5  ;;  %319 = vperm.xlu0 %1020, %v277_v12   ;;  %s1041_s16 = scalar_lea.vmem %s1040_s15, 128  ;;  %p1042_p1 = scmp.lt.s32.totalorder %s1372_s9, %s1040_s15 }
  0x1e   : > { %906 = vmatpush1.msk.msra.mxu0 %vm418_vm0, %v1213_v3  ;;  %324 = vperm.xlu1 %1021, %v278_v14   ;;  %p1037_p13 = pnand %p1036_p12, %p1188_p4  ;;  %p1043_p2 = scmp.lt.s32.totalorder %s1041_s16, %s1035_s14 }
  0x1f   : > { %907 = vmatmul.mubr.msk.f32.vlgmr.msra.gmra.mrb[0].mxu0 %vm369_vm1, %v255_v7 }
  0x20   : > { %493 = vmatprep.mubr.f32.mxu0 %v1115_v0  ;;  %p1038_p0 = pneg %p1037_p13  ;;  %p1044_p3 = por %p1043_p2, %p1042_p1 }
  0x21   : > { %329 = vperm.xlu0 %1020, %v279_v15  }
  0x22   : > { %334 = vperm.xlu1 %1021, %v280_v17   ;;  %p1045_p5 = pnand %p1044_p3, %p1038_p0 }
  0x23   : > { %908 = vmatmul.mubr.msk.f32.gmra.mrb[2].mxu0 %vm369_vm1, %v256_v10 }
  0x24   : > { %499 = vmatprep.mubr.f32.mxu0 %v1115_v0 }
  0x25   : > { %339 = vperm.xlu0 %1020, %v281_v18  }
  0x26   : > { %344 = vperm.xlu1 %1021, %v282_v20  }
  0x27   : > { %909 = vmatmul.mubr.msk.f32.gmra.mrb[4].mxu0 %vm369_vm1, %v257_v13 }
  0x28   : > { %505 = vmatprep.mubr.f32.mxu0 %v1115_v0 }
  0x29   : > { %349 = vperm.xlu0 %1020, %v283_v21  }
  0x2a   : > { %354 = vperm.xlu1 %1021, %v284_v23  }
  0x2b   : > { %910 = vmatmul.mubr.msk.f32.gmra.mrb[6].mxu0 %vm369_vm1, %v258_v16 }
  0x2c   : > { %511 = vmatprep.mubr.f32.mxu0 %v1115_v0 }
  0x2d   : > { %359 = vperm.xlu0 %1020, %v285_v24  }
  0x2e   : > { %364 = vperm.xlu1 %1021, %v286_v26  }
  0x2f   : > { %911 = vmatmul.mubr.msk.f32.gmra.mrb[8].mxu0 %vm369_vm1, %v259_v19 }
  0x30   : > { %517 = vmatprep.mubr.f32.mxu0 %v1115_v0 }
  0x31   : > { %620 = vperm.xlu0 %1020, %v617_v27  }
  0x33   : > { %912 = vmatmul.mubr.msk.f32.gmra.mrb[10].mxu0 %vm369_vm1, %v260_v22 }
  0x34   : > { %523 = vmatprep.mubr.f32.mxu0 %v1115_v0 }
  0x37   : > { %913 = vmatmul.mubr.msk.f32.gmra.mrb[12].mxu0 %vm369_vm1, %v261_v25 }
  0x38   : > { %529 = vmatprep.mubr.f32.mxu0 %v1115_v0 }
  0x3b   : > { %914 = vmatmul.mubr.msk.f32.gmra.mrb[14].mxu0 %vm369_vm1, %v262_v28 }
  0x3c   : > { %535 = vmatprep.mubr.f32.mxu0 %v1115_v0 }
  0x3f   : > { %915 = vmatmul.mubr.msk.f32.gmra.mrb[16].mxu0 %vm369_vm1, %v263_v29 }
  0x40   : > { %541 = vmatprep.mubr.f32.mxu0 %v1115_v0 }
  0x43   : > { %916 = vmatmul.mubr.msk.f32.gmra.mrb[18].mxu0 %vm369_vm1, %v264_v30 }
  0x44   : > { %547 = vmatprep.mubr.f32.mxu0 %v1115_v0 }
  0x47   : > { %917 = vmatmul.mubr.msk.f32.gmra.mrb[20].mxu0 %vm369_vm1, %v265_v31 }
  0x48   : > { %553 = vmatprep.mubr.f32.mxu0 %v1115_v0 }
  0x4b   : > { %918 = vmatmul.mubr.msk.f32.gmra.mrb[22].mxu0 %vm369_vm1, %v266_v32 }
  0x4c   : > { %559 = vmatprep.mubr.f32.mxu0 %v1115_v0 }
  0x4f   : > { %919 = vmatmul.mubr.msk.f32.gmra.mrb[24].mxu0 %vm369_vm1, %v267_v33 }
  0x50   : > { %565 = vmatprep.mubr.f32.mxu0 %v1115_v0 }
  0x53   : > { %920 = vmatmul.mubr.msk.f32.gmra.mrb[26].mxu0 %vm369_vm1, %v268_v34 }
  0x54   : > { %571 = vmatprep.mubr.f32.mxu0 %v1115_v0 }
  0x57   : > { %921 = vmatmul.mubr.msk.f32.gmra.mrb[28].mxu0 %vm369_vm1, %v269_v35 }
  0x58   : > { %577 = vmatprep.mubr.f32.mxu0 %v1115_v0 }
  0x5b   : > { %922 = vmatmul.mubr.msk.f32.gmra.mrb[30].mxu0 %vm369_vm1, %v270_v36 }
  0x90   : > { %v290_v37 = vpop.permute.xlu0 %289  ;;  %v300_v46 = vpop.permute.xlu1 %299 }
  0x94   : > { %v295_v41 = vpop.permute.xlu0 %294  ;;  %v305_v57 = vpop.permute.xlu1 %304 }
  0x98   : > { %v310_v8 = vpop.permute.xlu0 %309  ;;  %v315_v11 = vpop.permute.xlu1 %314 }
  0x9c   : > { %v320_v24 = vpop.permute.xlu0 %319 }
  0x9d   : > { %v325_v27 = vpop.permute.xlu1 %324 }
  0xf2   : > { %v489_v38 = vpop.f32.mrb[0].mxu0 }
  0xf3   : > { %v491_v39 = vpop.f32.mrb[1].mxu0  ;;  %v490_v40 = vadd.f32 %v489_v38, %v290_v37 }
  0xf4   : > { %v492_v42 = vadd.f32 %v491_v39, %v290_v37 }
  0xf5   : > { %v584_v48 = vmax.f32 %v490_v40, 0.0  ;;  %v330_v40 = vpop.permute.xlu0 %329 }
  0xf6   : > { %v495_v43 = vpop.f32.mrb[2].mxu0  ;;  %v585_v50 = vmax.f32 %v492_v42, 0.0 }
  0xf7   : > { %v496_v44 = vadd.f32 %v495_v43, %v295_v41  ;;  %v497_v45 = vpop.f32.mrb[3].mxu0  ;;  %v335_v43 = vpop.permute.xlu1 %334 }
  0xf8   : > { %v498_v47 = vadd.f32 %v497_v45, %v295_v41 }
  0xf9   : > { %v586_v49 = vmax.f32 %v496_v44, 0.0 }
  0xfa   : > { %v587_v51 = vmax.f32 %v498_v47, 0.0  ;;  %v501_v52 = vpop.f32.mrb[4].mxu0 }
  0xfb   : > { %v503_v53 = vpop.f32.mrb[5].mxu0  ;;  %v933_v54 = vpack.c.bf16 %v586_v49, %v584_v48  ;;  %v502_v56 = vadd.f32 %v501_v52, %v300_v46 }
  0xfc   : > { %v931_v55 = vpack.c.bf16 %v587_v51, %v585_v50  ;;  %v504_v58 = vadd.f32 %v503_v53, %v300_v46 }
  0xfd   : > { %v588_v63 = vmax.f32 %v502_v56, 0.0  ;;  %v340_v56 = vpop.permute.xlu0 %339 }
  0xfe   : > { %v507_v59 = vpop.f32.mrb[6].mxu0  ;;  %932 = vmatprep.subr.bf16.mxu1 %v931_v55  ;;  %v589_v1 = vmax.f32 %v504_v58, 0.0 }
  0xff   : > { %v508_v60 = vadd.f32 %v507_v59, %v305_v57  ;;  %v509_v61 = vpop.f32.mrb[7].mxu0  ;;  %934 = vmatpush1.bf16.msra.mxu1 %v933_v54  ;;  %v345_v59 = vpop.permute.xlu1 %344 }
 0x100   : > { %v510_v62 = vadd.f32 %v509_v61, %v305_v57 }
 0x101   : > { %v590_v0 = vmax.f32 %v508_v60, 0.0 }
 0x102   : > { %v591_v2 = vmax.f32 %v510_v62, 0.0  ;;  %v513_v4 = vpop.f32.mrb[8].mxu0 }
 0x103   : > { %v937_v6 = vpack.c.bf16 %v590_v0, %v588_v63  ;;  %v515_v7 = vpop.f32.mrb[9].mxu0  ;;  %v514_v10 = vadd.f32 %v513_v4, %v310_v8 }
 0x104   : > { %v935_v9 = vpack.c.bf16 %v591_v2, %v589_v1  ;;  %v516_v12 = vadd.f32 %v515_v7, %v310_v8 }
 0x105   : > { %v592_v17 = vmax.f32 %v514_v10, 0.0  ;;  %v350_v10 = vpop.permute.xlu0 %349 }
 0x106   : > { %v519_v13 = vpop.f32.mrb[10].mxu0  ;;  %936 = vmatprep.subr.bf16.mxu1 %v935_v9  ;;  %v593_v19 = vmax.f32 %v516_v12, 0.0 }
 0x107   : > { %v520_v14 = vadd.f32 %v519_v13, %v315_v11  ;;  %v521_v15 = vpop.f32.mrb[11].mxu0  ;;  %938 = vmatpush1.bf16.msra.mxu1 %v937_v6  ;;  %v355_v13 = vpop.permute.xlu1 %354 }
 0x108   : > { %v522_v16 = vadd.f32 %v521_v15, %v315_v11 }
 0x109   : > { %v594_v18 = vmax.f32 %v520_v14, 0.0 }
 0x10a   : > { %v595_v20 = vmax.f32 %v522_v16, 0.0  ;;  %v525_v21 = vpop.f32.mrb[12].mxu0 }
 0x10b   : > { %v941_v22 = vpack.c.bf16 %v594_v18, %v592_v17  ;;  %v527_v23 = vpop.f32.mrb[13].mxu0  ;;  %v526_v26 = vadd.f32 %v525_v21, %v320_v24 }
 0x10c   : > { %v939_v25 = vpack.c.bf16 %v595_v20, %v593_v19  ;;  %v528_v28 = vadd.f32 %v527_v23, %v320_v24 }
 0x10d   : > { %v596_v33 = vmax.f32 %v526_v26, 0.0  ;;  %v360_v26 = vpop.permute.xlu0 %359 }
 0x10e   : > { %v531_v29 = vpop.f32.mrb[14].mxu0  ;;  %940 = vmatprep.subr.bf16.mxu1 %v939_v25  ;;  %v597_v35 = vmax.f32 %v528_v28, 0.0 }
 0x10f   : > { %v532_v30 = vadd.f32 %v531_v29, %v325_v27  ;;  %v533_v31 = vpop.f32.mrb[15].mxu0  ;;  %942 = vmatpush1.bf16.msra.mxu1 %v941_v22  ;;  %v365_v29 = vpop.permute.xlu1 %364 }
 0x110   : > { %v534_v32 = vadd.f32 %v533_v31, %v325_v27 }
 0x111   : > { %v598_v34 = vmax.f32 %v532_v30, 0.0 }
 0x112   : > { %v599_v36 = vmax.f32 %v534_v32, 0.0  ;;  %v537_v37 = vpop.f32.mrb[16].mxu0 }
 0x113   : > { %v945_v38 = vpack.c.bf16 %v598_v34, %v596_v33  ;;  %v539_v39 = vpop.f32.mrb[17].mxu0  ;;  %v538_v42 = vadd.f32 %v537_v37, %v330_v40 }
 0x114   : > { %v943_v41 = vpack.c.bf16 %v599_v36, %v597_v35  ;;  %v540_v44 = vadd.f32 %v539_v39, %v330_v40 }
 0x115   : > { %v600_v49 = vmax.f32 %v538_v42, 0.0  ;;  %v621_v42 = vpop.permute.xlu0 %620 }
 0x116   : > { %v543_v45 = vpop.f32.mrb[18].mxu0  ;;  %944 = vmatprep.subr.bf16.mxu1 %v943_v41  ;;  %v601_v51 = vmax.f32 %v540_v44, 0.0  ;;  %v616_v41 = vld [vmem:[%s1420_s3] sm:$0xf] }
 0x117   : > { %v544_v46 = vadd.f32 %v543_v45, %v335_v43  ;;  %v545_v47 = vpop.f32.mrb[19].mxu0  ;;  %946 = vmatpush1.bf16.msra.mxu1 %v945_v38 }
 0x118   : > { %v546_v48 = vadd.f32 %v545_v47, %v335_v43 }
 0x119   : > { %v602_v50 = vmax.f32 %v544_v46, 0.0 }
 0x11a   : > { %v603_v52 = vmax.f32 %v546_v48, 0.0  ;;  %v549_v53 = vpop.f32.mrb[20].mxu0 }
 0x11b   : > { %v949_v54 = vpack.c.bf16 %v602_v50, %v600_v49  ;;  %v551_v55 = vpop.f32.mrb[21].mxu0  ;;  %v550_v58 = vadd.f32 %v549_v53, %v340_v56 }
 0x11c   : > { %v947_v57 = vpack.c.bf16 %v603_v52, %v601_v51  ;;  %v552_v60 = vadd.f32 %v551_v55, %v340_v56 }
 0x11d   : > { %v604_v1 = vmax.f32 %v550_v58, 0.0 }
 0x11e   : > { %v555_v61 = vpop.f32.mrb[22].mxu0  ;;  %948 = vmatprep.subr.bf16.mxu1 %v947_v57  ;;  %v605_v4 = vmax.f32 %v552_v60, 0.0 }
 0x11f   : > { %v556_v62 = vadd.f32 %v555_v61, %v345_v59  ;;  %v557_v63 = vpop.f32.mrb[23].mxu0  ;;  %950 = vmatpush1.bf16.msra.mxu1 %v949_v54 }
 0x120   : > { %v558_v0 = vadd.f32 %v557_v63, %v345_v59 }
 0x121   : > { %v606_v2 = vmax.f32 %v556_v62, 0.0 }
 0x122   : > { %v607_v6 = vmax.f32 %v558_v0, 0.0  ;;  %v561_v7 = vpop.f32.mrb[24].mxu0 }
 0x123   : > { %v953_v8 = vpack.c.bf16 %v606_v2, %v604_v1  ;;  %v563_v9 = vpop.f32.mrb[25].mxu0  ;;  %v562_v12 = vadd.f32 %v561_v7, %v350_v10 }
 0x124   : > { %v951_v11 = vpack.c.bf16 %v607_v6, %v605_v4  ;;  %v564_v14 = vadd.f32 %v563_v9, %v350_v10 }
 0x125   : > { %v608_v19 = vmax.f32 %v562_v12, 0.0 }
 0x126   : > { %v567_v15 = vpop.f32.mrb[26].mxu0  ;;  %952 = vmatprep.subr.bf16.mxu1 %v951_v11  ;;  %v609_v21 = vmax.f32 %v564_v14, 0.0 }
 0x127   : > { %v568_v16 = vadd.f32 %v567_v15, %v355_v13  ;;  %v569_v17 = vpop.f32.mrb[27].mxu0  ;;  %954 = vmatpush1.bf16.msra.mxu1 %v953_v8 }
 0x128   : > { %v570_v18 = vadd.f32 %v569_v17, %v355_v13 }
 0x129   : > { %v610_v20 = vmax.f32 %v568_v16, 0.0 }
 0x12a   : > { %v611_v22 = vmax.f32 %v570_v18, 0.0  ;;  %v573_v23 = vpop.f32.mrb[28].mxu0 }
 0x12b   : > { %v957_v24 = vpack.c.bf16 %v610_v20, %v608_v19  ;;  %v575_v25 = vpop.f32.mrb[29].mxu0  ;;  %v574_v28 = vadd.f32 %v573_v23, %v360_v26 }
 0x12c   : > { %v955_v27 = vpack.c.bf16 %v611_v22, %v609_v21  ;;  %v576_v30 = vadd.f32 %v575_v25, %v360_v26 }
 0x12d   : > { %v612_v35 = vmax.f32 %v574_v28, 0.0 }
 0x12e   : > { %v579_v31 = vpop.f32.mrb[30].mxu0  ;;  %956 = vmatprep.subr.bf16.mxu1 %v955_v27  ;;  %v613_v37 = vmax.f32 %v576_v30, 0.0 }
 0x12f   : > { %v580_v32 = vadd.f32 %v579_v31, %v365_v29  ;;  %v581_v33 = vpop.f32.mrb[31].mxu0  ;;  %958 = vmatpush1.bf16.msra.mxu1 %v957_v24 }
 0x130   : > { %v582_v34 = vadd.f32 %v581_v33, %v365_v29 }
 0x131   : > { %v614_v36 = vmax.f32 %v580_v32, 0.0 }
 0x132   : > { %v615_v38 = vmax.f32 %v582_v34, 0.0 }
 0x133   : > { %v961_v39 = vpack.c.bf16 %v614_v36, %v612_v35 }
 0x134   : > { %v959_v40 = vpack.c.bf16 %v615_v38, %v613_v37 }
 0x136   : > { %960 = vmatprep.subr.bf16.mxu1 %v959_v40 }
 0x137   : > { %962 = vmatpush1.bf16.msra.mxu1 %v961_v39 }
 0x13a   : > { %688 = vmatmul.mubr.f32.vlgmr.msra.gmra.mrb[0].mxu1 %v616_v41 }
 0x20d   : > { %v689_v43 = vpop.f32.mrb[0].mxu1 }
 0x20e   : > { %v690_v44 = vadd.f32 %v689_v43, %v621_v42  ;;  %v691_v45 = vpop.f32.mrb[1].mxu1 }
 0x20f   : > { %v692_v46 = vadd.f32 %v691_v45, %v621_v42 }
 0x210   : > { %v694_v47 = vsel %vm418_vm0, %v690_v44, -inf }
 0x211   : > { %v695_v48 = vrot.slane %v694_v47, 4  ;;  %v701_v49 = vsel %vm418_vm0, %v692_v46, -inf }
 0x212   : > { %v702_v50 = vrot.slane %v701_v49, 4 }
 0x213   : > { %v696_v51 = vmax.f32 %v694_v47, %v695_v48 }
 0x214   : > { %v703_v52 = vmax.f32 %v701_v49, %v702_v50 }
 0x215   : > { %v697_v53 = vrot.slane %v696_v51, 2 }
 0x216   : > { %v704_v54 = vrot.slane %v703_v52, 2 }
 0x217   : > { %v698_v55 = vmax.f32 %v696_v51, %v697_v53 }
 0x218   : > { %v705_v56 = vmax.f32 %v703_v52, %v704_v54 }
 0x219   : > { %v699_v57 = vrot.slane %v698_v55, 1 }
 0x21a   : > { %v706_v58 = vrot.slane %v705_v56, 1 }
 0x21b   : > { %v700_v59 = vmax.f32 %v698_v55, %v699_v57 }
 0x21c   : > { %v707_v60 = vmax.f32 %v705_v56, %v706_v58 }
 0x21d   : > { %v708_v61 = vsub.f32 %v690_v44, %v700_v59 }
 0x21e   : > { %v709_v62 = vsub.f32 %v692_v46, %v707_v60 }
 0x21f   : > { %v710_v63 = vmul.f32 1.442695, %v708_v61 }
 0x220   : > { %v712_v0 = vmul.f32 1.442695, %v709_v62 }
 0x221   : > { %1023 = vpow2.f32 %v710_v63 }
 0x222   : > { %1025 = vpow2.f32 %v712_v0 }
 0x22b   : > { %v1024_v1 = vpop.eup %1023 }
 0x22c   : > { %v1026_v2 = vpop.eup %1025  ;;  %v714_v4 = vsel %vm418_vm0, %v1024_v1, 0.0 }
 0x22d   : > { %v715_v6 = vrot.slane %v714_v4, 4  ;;  %v721_v7 = vsel %vm418_vm0, %v1026_v2, 0.0 }
 0x22e   : > { %v722_v8 = vrot.slane %v721_v7, 4 }
 0x22f   : > { %v716_v9 = vadd.f32 %v715_v6, %v714_v4 }
 0x230   : > { %v723_v10 = vadd.f32 %v722_v8, %v721_v7 }
 0x231   : > { %v717_v11 = vrot.slane %v716_v9, 2 }
 0x232   : > { %v724_v12 = vrot.slane %v723_v10, 2 }
 0x233   : > { %v718_v13 = vadd.f32 %v717_v11, %v716_v9 }
 0x234   : > { %v725_v14 = vadd.f32 %v724_v12, %v723_v10 }
 0x235   : > { %v719_v15 = vrot.slane %v718_v13, 1 }
 0x236   : > { %v726_v16 = vrot.slane %v725_v14, 1 }
 0x237   : > { %v720_v17 = vadd.f32 %v719_v15, %v718_v13 }
 0x238   : > { %v727_v18 = vadd.f32 %v726_v16, %v725_v14 }
 0x239   : > { %1027 = vrcp.f32 %v720_v17 }
 0x23a   : > { %1029 = vrcp.f32 %v727_v18 }
 0x243   : > { %v1028_v19 = vpop.eup %1027 }
 0x244   : > { %v1030_v20 = vpop.eup %1029  ;;  %v730_v21 = vmul.f32 %v1028_v19, %v1024_v1 }
 0x245   : > { %v731_v22 = vmul.f32 %v1030_v20, %v1026_v2 }
 0x246   : > { %v733_v23 = vmul.f32 %v730_v21, %v1213_v3 }
 0x247   : > { %v734_v24 = vmul.f32 %v731_v22, %v1220_v5 }
 0x248   : > { %v751_v25 = vmul.f32 %v733_v23, %v1213_v3  ;;  %v735_v26 = vsel %vm418_vm0, %v733_v23, 0.0 }
 0x249   : > { %v752_v27 = vmul.f32 %v734_v24, %v1220_v5  ;;  %v736_v28 = vrot.slane %v735_v26, 4  ;;  %v742_v29 = vsel %vm418_vm0, %v734_v24, 0.0 }
 0x24a   : > { %v753_v30 = vsel %vm418_vm0, %v751_v25, 0.0  ;;  %v743_v31 = vrot.slane %v742_v29, 4 }
 0x24b   : > { %v754_v32 = vrot.slane %v753_v30, 4  ;;  %v760_v33 = vsel %vm418_vm0, %v752_v27, 0.0  ;;  %v737_v34 = vadd.f32 %v736_v28, %v735_v26 }
 0x24c   : > { %v761_v35 = vrot.slane %v760_v33, 4  ;;  %v744_v36 = vadd.f32 %v743_v31, %v742_v29 }
 0x24d   : > { %v755_v37 = vadd.f32 %v754_v32, %v753_v30  ;;  %v738_v38 = vrot.slane %v737_v34, 2 }
 0x24e   : > { %v762_v39 = vadd.f32 %v761_v35, %v760_v33  ;;  %v745_v3 = vrot.slane %v744_v36, 2 }
 0x24f   : > { %v739_v40 = vadd.f32 %v738_v38, %v737_v34  ;;  %v756_v41 = vrot.slane %v755_v37, 2 }
 0x250   : > { %v746_v42 = vadd.f32 %v745_v3, %v744_v36  ;;  %v763_v5 = vrot.slane %v762_v39, 2 }
 0x251   : > { %v740_v43 = vrot.slane %v739_v40, 1  ;;  %v757_v44 = vadd.f32 %v756_v41, %v755_v37 }
 0x252   : > { %v747_v45 = vrot.slane %v746_v42, 1  ;;  %v764_v46 = vadd.f32 %v763_v5, %v762_v39 }
 0x253   : > { %v741_v47 = vadd.f32 %v740_v43, %v739_v40  ;;  %v758_v50 = vrot.slane %v757_v44, 1 }
 0x254   : > { %v748_v48 = vadd.f32 %v747_v45, %v746_v42  ;;  %v765_v52 = vrot.slane %v764_v46, 1 }
 0x255   : > { %v749_v49 = vmul.f32 0.25, %v741_v47  ;;  %v759_v55 = vadd.f32 %v758_v50, %v757_v44 }
 0x256   : > { %v750_v51 = vmul.f32 0.25, %v748_v48  ;;  %v766_v57 = vadd.f32 %v765_v52, %v764_v46 }
 0x257   : > { %v767_v53 = vmul.f32 4.0, %v749_v49 }
 0x258   : > { %v768_v54 = vmul.f32 4.0, %v750_v51 }
 0x259   : > { %v769_v56 = vmul.f32 %v767_v53, %v749_v49 }
 0x25a   : > { %v770_v58 = vmul.f32 %v768_v54, %v750_v51 }
 0x25b   : > { %v771_v59 = vsub.f32 %v759_v55, %v769_v56 }
 0x25c   : > { %v772_v60 = vsub.f32 %v766_v57, %v770_v58 }
 0x25d   : > { %v773_v61 = vmax.f32 %v771_v59, 1e-08 }
 0x25e   : > { %v774_v62 = vmax.f32 %v772_v60, 1e-08 }
 0x25f   : > { %1031 = vrsqrt.f32 %v773_v61  ;;  %vm777_vm2 = vcmp.eq.f32.partialorder %v773_v61, inf  ;;  %v780_v2 = vand.u32 2147483648, %v773_v61  ;;  %vm779_vm4 = vcmp.eq.f32.partialorder %v773_v61, 0.0 }
 0x260   : > { %1033 = vrsqrt.f32 %v774_v62  ;;  %vm784_vm5 = vcmp.eq.f32.partialorder %v774_v62, inf  ;;  %v787_v7 = vand.u32 2147483648, %v774_v62  ;;  %vm786_vm6 = vcmp.eq.f32.partialorder %v774_v62, 0.0 }
 0x269   : > { %v1032_v63 = vpop.eup %1031 }
 0x26a   : > { %v1034_v0 = vpop.eup %1033  ;;  %v776_v1 = vmul.f32 %v1032_v63, %v773_v61 }
 0x26b   : > { %v783_v4 = vmul.f32 %v1034_v0, %v774_v62 }
 0x26c   : > { %v778_v6 = vsel %vm777_vm2, %v773_v61, %v776_v1 }
 0x26d   : > { %v781_v8 = vsel %vm779_vm4, %v780_v2, %v778_v6  ;;  %v785_v9 = vsel %vm784_vm5, %v774_v62, %v783_v4 }
 0x26e   : > { %v788_v10 = vsel %vm786_vm6, %v787_v7, %v785_v9  ;;  %v790_v11 = vsel %vm789_vm3, %v749_v49, %v781_v8 }
 0x26f   : > { %v791_v12 = vsel %vm789_vm3, %v750_v51, %v788_v10 }
 0x270   : > { %v794_v13 = vcombine.low %v790_v11, %v791_v12 }
 0x272   : > { %923 = vst.sshfl [vmem:[%s242_s8] sm:$0x33 pattern:$0x76325410] %v794_v13 }
 0x273   : > { %1048 = shalt.err (!%p1045_p5)
}
 0x274   : > { %s1049_s17 = scalar_lea.hbm %s1370_s12, 64  ;;  %s1053_s27 = scalar_lea.hbm %s1422_s5, 128 }
 0x275   : > { %p1050_p6 = scmp.ne.s32.totalorder %s1370_s12, %s1049_s17  ;;  %p1054_p10 = scmp.lt.u32.totalorder %s1370_s12, %s1422_s5 }
 0x276   : > { %p1055_p11 = scmp.lt.u32.totalorder %s1053_s27, %s1049_s17  ;;  %p1057_p13 = scmp.lt.u32.totalorder %s1049_s17, %s1370_s12 }
 0x277   : > { %p1051_p7 = pnand %p1050_p6, %p1188_p4 }
 0x278   : > { %p1056_p12 = por %p1055_p11, %p1054_p10 }
 0x279   : > { %p1052_p9 = pneg %p1051_p7 }
 0x27a   : > { %p1058_p0 = por %p1057_p13, %p1056_p12 }
 0x27c   : > { %p1059_p1 = pnand %p1058_p0, %p1052_p9 }
 0x27e   : > { %1062 = shalt.err (!%p1059_p1)
}
 0x27f   : > { %963 = dma.vmem_to_hbm [thread:$0]  (%p1188_p4), %s1372_s9, 64, %s1370_s12, %s805_s13  }
 0x280 PF: > { %p969_p2 = scmp.ge.s32.totalorder %s1113_s23, 2  ;;  %s833_s8 = sand.u32 1, %s1093_s18  }
 0x281   : > { %s834_s10 = scalar_lea.sflag [#allocation3], %s833_s8 }
 0x282   : > { %p966_p3 = pnand %p969_p2, %p1195_p8 }
 0x284   : > { %1088 = dma.done.wait (!%p966_p3), %s834_s10, 64  }
 0x285   : > { %1090 = vsyncadd (!%p966_p3), %s834_s10, 4294967232  ;;  %s18_s23 = sadd.s32 1, %s1113_s23   ;;  %s1425_s18 = smov %s1097_s19 }
 0x286   : > { %p15_p5 = scmp.ge.s32.totalorder %s18_s23, 4   ;;  %s1426_s19 = smov %s1101_s20 }
 0x287   : > { %s1427_s20 = smov %s1201_s6  ;;  %s1428_s21 = smov %s1109_s22 }
 0x288   : > { %s1429_s22 = smov %s1431_s26  ;;  %17 = sbr.rel (!%p15_p5) target bundleno = 4 (0x4), region = 75 }
 0x28f   :  { %839 = vsyncpa [#allocation3], 1 }
 0x290   :  { %841 = vsyncpa [#allocation3 + $0x1], 1 }

</bundles_post_ra>
